<compile_context>
chip_gen: v5e
topology: v5e:2x2
jax: 0.10.0
libtpu: 0.0.40
codegen_flags: <defaults>
</compile_context>

<pallas_src>
import functools

import jax
import jax.numpy as jnp
from jax.experimental import pallas as pl
from jax.experimental.pallas import tpu as pltpu

RESNET_DIM = 1000
RESNET_PAD = 1024          # lane-dense padding of the 1000-wide feature
FC_DIM = 32
HID = 128
LANE = 128
TILE_TARGET_BYTES = 6 * 1024 * 1024   # per streamed image tile (2 buffers << VMEM limit)


def _round_up(x, m):
    return (x + m - 1) // m * m


def _accumulate_tile(img_ref, acc_ref):
    """Lane-dense partial sums of one streamed image tile.

    Pure VPU adds over static, aligned 128-lane slices of the ref (the f32
    widening is fused into each add).  No cross-lane (XLU) reduce and no
    masked narrow stores on the hot path -- the single cross-lane reduce
    happens once per batch block, in the finalize step.
    """
    _, width = img_ref.shape
    nfull = width // LANE
    if nfull:
        s = img_ref[:, 0:LANE].astype(jnp.float32)
        for k in range(1, nfull):
            s = s + img_ref[:, k * LANE:(k + 1) * LANE].astype(jnp.float32)
        acc_ref[...] += s
    rem = width - nfull * LANE
    if rem:  # ragged-HW fallback (only when block_hw == HW and HW % 128 != 0)
        acc_ref[:, :rem] += img_ref[:, nfull * LANE:].astype(jnp.float32)


def gde_kernel(
    img_ref,    # [rows, block_hw] streamed image rows (row = local_b*C + c), native dtype
    pos_ref,    # [block_b, 128]  f32 head_position, zero-padded lanes
    sel_ref,    # [block_b, rows] f32 0/1 image-row -> batch-row selection matrix
    we_ref,     # [rows, 1024]    f32 backbone weight row wb[c] tiled per image row
    bb_ref,     # [1, 1024]
    w1_ref,     # [128, 128]      fc_headpostion layer 0 (rows 3.. zero)
    b1_ref,     # [1, 128]
    w2_ref,     # [128, 128]      fc_headpostion layer 2 (cols 32.. zero)
    b2_ref,     # [1, 128]
    w3a_ref,    # [1024, 128]     fc_to_gaze layer 0, resnet-feature part (rows 1000.. zero)
    w3b_ref,    # [128, 128]      fc_to_gaze layer 0, fc-feature part (rows 32.. zero)
    b3_ref,     # [1, 128]
    w4_ref,     # [128, 128]      fc_to_gaze layer 2, no bias (cols 3.. zero)
    out_ref,    # [block_b, 128]
    acc_ref,    # [rows, 128] f32 scratch -- lane-dense GAP partial sums
    *, inv_hw,
):
    hw = pl.program_id(1)

    @pl.when(hw == 0)
    def _init():
        acc_ref[...] = jnp.zeros_like(acc_ref)

    # Streamed lane-dense partial sums (VPU only), overlapped with the next DMA.
    _accumulate_tile(img_ref, acc_ref)

    @pl.when(hw == pl.num_programs(1) - 1)
    def _finalize():
        f32 = jnp.float32

        # One cross-lane reduce per batch block (not per HW tile).
        row_sums = jnp.sum(acc_ref[...], axis=-1, keepdims=True)      # [rows, 1]

        # Backbone stand-in: GAP -> Linear(3 -> 1024 padded); gap @ wb is
        # computed exactly as Sel @ (row_mean * We).
        prod = (row_sums * inv_hw) * we_ref[...]                      # [rows, 1024]
        resnet_feature = (
            jnp.dot(sel_ref[...], prod, preferred_element_type=f32) + bb_ref[...]
        )                                                             # [block_b, 1024]

        # fc_headpostion: Linear(3,128) -> ReLU -> Linear(128,32) (padded to 128 lanes).
        h = jnp.dot(pos_ref[...], w1_ref[...], preferred_element_type=f32) + b1_ref[...]
        h = jnp.maximum(h, 0.0)
        fc_feature = jnp.dot(h, w2_ref[...], preferred_element_type=f32) + b2_ref[...]

        # fc_to_gaze on concat([resnet_feature, fc_feature]): split-weight sum (exact).
        g = (
            jnp.dot(resnet_feature, w3a_ref[...], preferred_element_type=f32)
            + jnp.dot(fc_feature, w3b_ref[...], preferred_element_type=f32)
            + b3_ref[...]
        )
        g = jnp.maximum(g, 0.0)
        out_ref[...] = jnp.dot(
            g, w4_ref[...], preferred_element_type=f32
        ).astype(out_ref.dtype)


def gde_forward(head_image, head_position, params, *, block_b=None, block_hw=None):
    """head_image: [B, 3, H, W] (any float dtype; bf16 halves streamed HBM bytes);
    head_position: [B, 3]."""
    B, C, H, W = head_image.shape
    HW = H * W
    f32 = jnp.float32

    # The image stays in HBM untouched: free row-major reshape, NO pad, NO cast.
    img = head_image.reshape(B * C, HW)
    itemsize = img.dtype.itemsize

    # ---- batch blocking --------------------------------------------------------
    # block_b must divide B (the image is never padded).  Prefer blocks whose
    # image-row count (block_b*C) is 16-sublane aligned (bf16 packing) and that
    # yield >= 2 batch blocks so the "parallel" axis splits across both
    # TensorCores on v7x megacore parts.
    if block_b is None:
        aligned = [d for d in (16, 8) if B % d == 0]
        multi = [d for d in aligned if B // d >= 2]
        block_b = multi[0] if multi else (aligned[0] if aligned else B)
    assert B % block_b == 0, "block_b must divide B (the image is not padded)"
    n_b = B // block_b
    rows = block_b * C

    # ---- HW blocking -----------------------------------------------------------
    # Large lane-dense tiles (target ~6 MB, well past the 2-4 MB DMA-length knee)
    # chosen as exact divisors of HW so the image needs no padding pass.
    if block_hw is None:
        if HW % LANE != 0:
            # TODO(synk): ragged HW is kept as a single full-width tile; tiling it
            # without padding would need in-kernel lane masking.
            block_hw = HW
        else:
            m = HW // LANE
            cap = max(1, TILE_TARGET_BYTES // (rows * itemsize * LANE))
            d = m if cap >= m else max(
                k for k in range(1, m + 1) if m % k == 0 and k <= cap)
            block_hw = d * LANE
    assert HW % block_hw == 0, "block_hw must divide H*W (the image is not padded)"
    n_hw = HW // block_hw
    tile_bytes = _round_up(rows, 16) * block_hw * itemsize

    # ---- small operands / weights (zero padding only -> math stays exact) ------
    pos = jnp.pad(head_position.astype(f32), ((0, 0), (0, LANE - 3)))

    wb_p = jnp.pad(params["wb"].astype(f32),
                   ((0, 0), (0, RESNET_PAD - RESNET_DIM)))              # [3, 1024]
    we = jnp.tile(wb_p, (block_b, 1))                                   # [rows, 1024]
    bb_p = jnp.pad(params["bb"].astype(f32).reshape(1, RESNET_DIM),
                   ((0, 0), (0, RESNET_PAD - RESNET_DIM)))              # [1, 1024]

    w1_p = jnp.pad(params["w1"].astype(f32), ((0, LANE - 3), (0, 0)))          # [128,128]
    b1_p = params["b1"].astype(f32).reshape(1, HID)
    w2_p = jnp.pad(params["w2"].astype(f32), ((0, 0), (0, LANE - FC_DIM)))     # [128,128]
    b2_p = jnp.pad(params["b2"].astype(f32).reshape(1, FC_DIM),
                   ((0, 0), (0, LANE - FC_DIM)))                               # [1,128]
    w3 = params["w3"].astype(f32)                                              # [1032,128]
    w3a_p = jnp.pad(w3[:RESNET_DIM], ((0, RESNET_PAD - RESNET_DIM), (0, 0)))   # [1024,128]
    w3b_p = jnp.pad(w3[RESNET_DIM:], ((0, LANE - FC_DIM), (0, 0)))             # [128,128]
    b3_p = params["b3"].astype(f32).reshape(1, HID)
    w4_p = jnp.pad(params["w4"].astype(f32), ((0, 0), (0, LANE - 3)))          # [128,128]

    # Sel[b_local, r_local] = 1 iff image row r_local belongs to batch row b_local.
    sel = (jnp.arange(rows)[None, :] // C
           == jnp.arange(block_b)[:, None]).astype(f32)                 # [block_b, rows]

    kernel = functools.partial(gde_kernel, inv_hw=float(1.0 / HW))
    const = lambda bi, hw: (0, 0)

    # The constant operands (Sel, We, all weights/biases) use constant index_maps
    # so they are DMA'd once and stay VMEM-resident across the whole grid.
    grid_spec = pltpu.PrefetchScalarGridSpec(
        num_scalar_prefetch=0,
        grid=(n_b, n_hw),                                   # reduction (hw) axis last
        in_specs=[
            pl.BlockSpec((rows, block_hw), lambda bi, hw: (bi, hw)),   # image stream
            pl.BlockSpec((block_b, LANE), lambda bi, hw: (bi, 0)),     # head_position
            pl.BlockSpec((block_b, rows), const),                      # Sel
            pl.BlockSpec((rows, RESNET_PAD), const),                   # We
            pl.BlockSpec((1, RESNET_PAD), const),                      # bb
            pl.BlockSpec((LANE, HID), const),                          # w1
            pl.BlockSpec((1, HID), const),                             # b1
            pl.BlockSpec((HID, LANE), const),                          # w2
            pl.BlockSpec((1, LANE), const),                            # b2
            pl.BlockSpec((RESNET_PAD, HID), const),                    # w3a
            pl.BlockSpec((LANE, HID), const),                          # w3b
            pl.BlockSpec((1, HID), const),                             # b3
            pl.BlockSpec((HID, LANE), const),                          # w4
        ],
        out_specs=pl.BlockSpec((block_b, LANE), lambda bi, hw: (bi, 0)),
        scratch_shapes=[pltpu.VMEM((rows, LANE), jnp.float32)],
    )

    out = pl.pallas_call(
        kernel,
        out_shape=jax.ShapeDtypeStruct((B, LANE), f32),
        grid_spec=grid_spec,
        compiler_params=pltpu.CompilerParams(
            dimension_semantics=("parallel", "arbitrary"),   # batch across cores, hw reduces
            vmem_limit_bytes=int(min(112 << 20,
                                     max(32 << 20, 3 * tile_bytes + (8 << 20)))),
        ),
    )(img, pos, sel, we, bb_p, w1_p, b1_p, w2_p, b2_p, w3a_p, w3b_p, b3_p, w4_p)

    return out[:, :3]                                        # drop lane padding


def init_params(key):
    """Deterministic synthetic parameters, stored as [in, out] (transposed vs torch)."""
    ks = jax.random.split(key, 9)

    def w(k, shape, scale=0.02):
        return (scale * jax.random.normal(k, shape)).astype(jnp.float32)

    return {
        # TODO(synk): pretrained ResNet50 not translated; GAP + Linear(3->1000) stand-in.
        "wb": w(ks[0], (3, RESNET_DIM)),
        "bb": w(ks[1], (RESNET_DIM,)),
        # fc_headpostion: Linear(3,128), Linear(128,32)
        "w1": w(ks[2], (3, HID)),
        "b1": w(ks[3], (HID,)),
        "w2": w(ks[4], (HID, FC_DIM)),
        "b2": w(ks[5], (FC_DIM,)),
        # fc_to_gaze: Linear(1032,128), Linear(128,3, bias=False)
        "w3": w(ks[6], (RESNET_DIM + FC_DIM, HID)),
        "b3": w(ks[7], (HID,)),
        "w4": w(ks[8], (HID, 3)),
    }


def _reference(head_image, head_position, p):
    """Pure-JAX reference of the same forward pass (image in its given dtype)."""
    B, C, H, W = head_image.shape
    img = head_image.astype(jnp.float32)
    gap = jnp.mean(img.reshape(B, C, H * W), axis=-1)
    resnet_feature = gap @ p["wb"] + p["bb"][None, :]
    h = jnp.maximum(head_position @ p["w1"] + p["b1"][None, :], 0.0)
    fc_feature = h @ p["w2"] + p["b2"][None, :]
    feature = jnp.concatenate([resnet_feature, fc_feature], axis=1)
    g = jnp.maximum(feature @ p["w3"] + p["b3"][None, :], 0.0)
    return g @ p["w4"]


if __name__ == "__main__":
    key = jax.random.PRNGKey(0)
    k_img, k_pos, k_par = jax.random.split(key, 3)

    B, C, H, W = 2, 3, 16, 16
    # Provide the image in bf16 so the kernel streams 2 B/elem from HBM with no
    # separate wrapper-side cast pass (the kernel accepts any float dtype).
    head_image = jax.random.normal(
        k_img, (B, C, H, W), dtype=jnp.float32).astype(jnp.bfloat16)
    head_position = jax.random.normal(k_pos, (B, 3), dtype=jnp.float32)
    params = init_params(k_par)

    gaze = jax.block_until_ready(gde_forward(head_image, head_position, params))
    ref = _reference(head_image, head_position, params)

    assert gaze.shape == (B, 3)
    assert jnp.allclose(gaze, ref, atol=1e-4, rtol=1e-3)
    print("KERNEL_OK")
</pallas_src>

<mosaic_0001>
module attributes {stable_mosaic.version = 11 : i64} {
  func.func @gde_kernel(%arg0: i32, %arg1: i32, %arg2: memref<6x256xbf16, #tpu.memory_space<vmem>>, %arg3: memref<2x128xf32, #tpu.memory_space<vmem>>, %arg4: memref<2x6xf32, #tpu.memory_space<vmem>>, %arg5: memref<6x1024xf32, #tpu.memory_space<vmem>>, %arg6: memref<1x1024xf32, #tpu.memory_space<vmem>>, %arg7: memref<128x128xf32, #tpu.memory_space<vmem>>, %arg8: memref<1x128xf32, #tpu.memory_space<vmem>>, %arg9: memref<128x128xf32, #tpu.memory_space<vmem>>, %arg10: memref<1x128xf32, #tpu.memory_space<vmem>>, %arg11: memref<1024x128xf32, #tpu.memory_space<vmem>>, %arg12: memref<128x128xf32, #tpu.memory_space<vmem>>, %arg13: memref<1x128xf32, #tpu.memory_space<vmem>>, %arg14: memref<128x128xf32, #tpu.memory_space<vmem>>, %arg15: memref<2x128xf32, #tpu.memory_space<vmem>>, %arg16: memref<6x128xf32, #tpu.memory_space<vmem>>) attributes {dimension_semantics = [#tpu.dimension_semantics<parallel>, #tpu.dimension_semantics<arbitrary>], iteration_bounds = array<i64: 1, 1>, scalar_prefetch = 0 : i64, scratch_operands = 1 : i64, tpu.core_type = #tpu.core_type<tc>, window_params = [{transform_indices = @transform_0, window_bounds = array<i64: 6, 256>}, {transform_indices = @transform_1, window_bounds = array<i64: 2, 128>}, {pipeline_mode = #tpu.pipeline_mode<synchronous>, transform_indices = @transform_2, window_bounds = array<i64: 2, 6>}, {pipeline_mode = #tpu.pipeline_mode<synchronous>, transform_indices = @transform_3, window_bounds = array<i64: 6, 1024>}, {pipeline_mode = #tpu.pipeline_mode<synchronous>, transform_indices = @transform_4, window_bounds = array<i64: 1, 1024>}, {pipeline_mode = #tpu.pipeline_mode<synchronous>, transform_indices = @transform_5, window_bounds = array<i64: 128, 128>}, {pipeline_mode = #tpu.pipeline_mode<synchronous>, transform_indices = @transform_6, window_bounds = array<i64: 1, 128>}, {pipeline_mode = #tpu.pipeline_mode<synchronous>, transform_indices = @transform_7, window_bounds = array<i64: 128, 128>}, {pipeline_mode = #tpu.pipeline_mode<synchronous>, transform_indices = @transform_8, window_bounds = array<i64: 1, 128>}, {pipeline_mode = #tpu.pipeline_mode<synchronous>, transform_indices = @transform_9, window_bounds = array<i64: 1024, 128>}, {pipeline_mode = #tpu.pipeline_mode<synchronous>, transform_indices = @transform_10, window_bounds = array<i64: 128, 128>}, {pipeline_mode = #tpu.pipeline_mode<synchronous>, transform_indices = @transform_11, window_bounds = array<i64: 1, 128>}, {pipeline_mode = #tpu.pipeline_mode<synchronous>, transform_indices = @transform_12, window_bounds = array<i64: 128, 128>}, {transform_indices = @transform_13, window_bounds = array<i64: 2, 128>}]} {
    %c0_i32 = arith.constant 0 : i32
    %0 = arith.cmpi eq, %arg1, %c0_i32 : i32
    %1 = arith.extui %0 : i1 to i32
    %c0_i32_0 = arith.constant 0 : i32
    %2 = arith.cmpi ne, %1, %c0_i32_0 : i32
    scf.if %2 {
      %cst = arith.constant 0.000000e+00 : f32
      %14 = vector.broadcast %cst : f32 to vector<6x128xf32>
      %c0_9 = arith.constant 0 : index
      %c0_10 = arith.constant 0 : index
      %15 = vector.load %arg16[%c0_9, %c0_10] : memref<6x128xf32, #tpu.memory_space<vmem>>, vector<6x128xf32>
      tpu.vector_store %arg16[%c0_9, %c0_10], %14 {strides = array<i32>} : memref<6x128xf32, #tpu.memory_space<vmem>>, vector<6x128xf32>,
    } else {
    }
    %c0 = arith.constant 0 : index
    %c0_1 = arith.constant 0 : index
    %3 = vector.load %arg2[%c0, %c0_1] : memref<6x256xbf16, #tpu.memory_space<vmem>>, vector<6x128xbf16>
    %4 = arith.extf %3 : vector<6x128xbf16> to vector<6x128xf32>
    %c0_2 = arith.constant 0 : index
    %c128 = arith.constant 128 : index
    %5 = vector.load %arg2[%c0_2, %c128] : memref<6x256xbf16, #tpu.memory_space<vmem>>, vector<6x128xbf16>
    %6 = arith.extf %5 : vector<6x128xbf16> to vector<6x128xf32>
    %7 = arith.addf %4, %6 : vector<6x128xf32>
    %c0_3 = arith.constant 0 : index
    %c0_4 = arith.constant 0 : index
    %8 = vector.load %arg16[%c0_3, %c0_4] : memref<6x128xf32, #tpu.memory_space<vmem>>, vector<6x128xf32>
    %9 = arith.addf %8, %7 : vector<6x128xf32>
    %c0_5 = arith.constant 0 : index
    %c0_6 = arith.constant 0 : index
    %10 = vector.load %arg16[%c0_5, %c0_6] : memref<6x128xf32, #tpu.memory_space<vmem>>, vector<6x128xf32>
    tpu.vector_store %arg16[%c0_5, %c0_6], %9 {strides = array<i32>} : memref<6x128xf32, #tpu.memory_space<vmem>>, vector<6x128xf32>,
    %c0_i32_7 = arith.constant 0 : i32
    %11 = arith.cmpi eq, %arg1, %c0_i32_7 : i32
    %12 = arith.extui %11 : i1 to i32
    %c0_i32_8 = arith.constant 0 : i32
    %13 = arith.cmpi ne, %12, %c0_i32_8 : i32
    scf.if %13 {
      %c0_9 = arith.constant 0 : index
      %c0_10 = arith.constant 0 : index
      %14 = vector.load %arg16[%c0_9, %c0_10] : memref<6x128xf32, #tpu.memory_space<vmem>>, vector<6x128xf32>
      %cst = arith.constant dense<0.000000e+00> : vector<6xf32>
      %15 = vector.multi_reduction <add>, %14, %cst [1] : vector<6x128xf32> to vector<6xf32>
      %16 = vector.shape_cast %15 : vector<6xf32> to vector<6x1xf32>
      %cst_11 = arith.constant 3.906250e-03 : f32
      %17 = vector.broadcast %cst_11 : f32 to vector<6x1xf32>
      %18 = arith.mulf %16, %17 : vector<6x1xf32>
      %c0_12 = arith.constant 0 : index
      %c0_13 = arith.constant 0 : index
      %19 = vector.load %arg5[%c0_12, %c0_13] : memref<6x1024xf32, #tpu.memory_space<vmem>>, vector<6x1024xf32>
      %20 = vector.broadcast %18 : vector<6x1xf32> to vector<6x1024xf32>
      %21 = arith.mulf %20, %19 : vector<6x1024xf32>
      %c0_14 = arith.constant 0 : index
      %c0_15 = arith.constant 0 : index
      %22 = vector.load %arg4[%c0_14, %c0_15] : memref<2x6xf32, #tpu.memory_space<vmem>>, vector<2x6xf32>
      %cst_16 = arith.constant dense<0.000000e+00> : vector<2x1024xf32>
      %23 = tpu.matmul %22, %21, %cst_16 {dimension_numbers = #tpu.dot_dimension_numbers<[1], [0], [0], [1], [0, 0, 1, 1], [], []>} : vector<2x6xf32>, vector<6x1024xf32>, vector<2x1024xf32> -> vector<2x1024xf32>
      %c0_17 = arith.constant 0 : index
      %c0_18 = arith.constant 0 : index
      %24 = vector.load %arg6[%c0_17, %c0_18] : memref<1x1024xf32, #tpu.memory_space<vmem>>, vector<1x1024xf32>
      %25 = vector.broadcast %24 : vector<1x1024xf32> to vector<2x1024xf32>
      %26 = arith.addf %23, %25 : vector<2x1024xf32>
      %c0_19 = arith.constant 0 : index
      %c0_20 = arith.constant 0 : index
      %27 = vector.load %arg3[%c0_19, %c0_20] : memref<2x128xf32, #tpu.memory_space<vmem>>, vector<2x128xf32>
      %c0_21 = arith.constant 0 : index
      %c0_22 = arith.constant 0 : index
      %28 = vector.load %arg7[%c0_21, %c0_22] : memref<128x128xf32, #tpu.memory_space<vmem>>, vector<128x128xf32>
      %cst_23 = arith.constant dense<0.000000e+00> : vector<2x128xf32>
      %29 = tpu.matmul %27, %28, %cst_23 {dimension_numbers = #tpu.dot_dimension_numbers<[1], [0], [0], [1], [0, 0, 1, 1], [], []>} : vector<2x128xf32>, vector<128x128xf32>, vector<2x128xf32> -> vector<2x128xf32>
      %c0_24 = arith.constant 0 : index
      %c0_25 = arith.constant 0 : index
      %30 = vector.load %arg8[%c0_24, %c0_25] : memref<1x128xf32, #tpu.memory_space<vmem>>, vector<1x128xf32>
      %31 = vector.broadcast %30 : vector<1x128xf32> to vector<2x128xf32>
      %32 = arith.addf %29, %31 : vector<2x128xf32>
      %cst_26 = arith.constant 0.000000e+00 : f32
      %33 = vector.broadcast %cst_26 : f32 to vector<2x128xf32>
      %34 = arith.maximumf %32, %33 : vector<2x128xf32>
      %c0_27 = arith.constant 0 : index
      %c0_28 = arith.constant 0 : index
      %35 = vector.load %arg9[%c0_27, %c0_28] : memref<128x128xf32, #tpu.memory_space<vmem>>, vector<128x128xf32>
      %cst_29 = arith.constant dense<0.000000e+00> : vector<2x128xf32>
      %36 = tpu.matmul %34, %35, %cst_29 {dimension_numbers = #tpu.dot_dimension_numbers<[1], [0], [0], [1], [0, 0, 1, 1], [], []>} : vector<2x128xf32>, vector<128x128xf32>, vector<2x128xf32> -> vector<2x128xf32>
      %c0_30 = arith.constant 0 : index
      %c0_31 = arith.constant 0 : index
      %37 = vector.load %arg10[%c0_30, %c0_31] : memref<1x128xf32, #tpu.memory_space<vmem>>, vector<1x128xf32>
      %38 = vector.broadcast %37 : vector<1x128xf32> to vector<2x128xf32>
      %39 = arith.addf %36, %38 : vector<2x128xf32>
      %c0_32 = arith.constant 0 : index
      %c0_33 = arith.constant 0 : index
      %40 = vector.load %arg11[%c0_32, %c0_33] : memref<1024x128xf32, #tpu.memory_space<vmem>>, vector<1024x128xf32>
      %cst_34 = arith.constant dense<0.000000e+00> : vector<2x128xf32>
      %41 = tpu.matmul %26, %40, %cst_34 {dimension_numbers = #tpu.dot_dimension_numbers<[1], [0], [0], [1], [0, 0, 1, 1], [], []>} : vector<2x1024xf32>, vector<1024x128xf32>, vector<2x128xf32> -> vector<2x128xf32>
      %c0_35 = arith.constant 0 : index
      %c0_36 = arith.constant 0 : index
      %42 = vector.load %arg12[%c0_35, %c0_36] : memref<128x128xf32, #tpu.memory_space<vmem>>, vector<128x128xf32>
      %cst_37 = arith.constant dense<0.000000e+00> : vector<2x128xf32>
      %43 = tpu.matmul %39, %42, %cst_37 {dimension_numbers = #tpu.dot_dimension_numbers<[1], [0], [0], [1], [0, 0, 1, 1], [], []>} : vector<2x128xf32>, vector<128x128xf32>, vector<2x128xf32> -> vector<2x128xf32>
      %44 = arith.addf %41, %43 : vector<2x128xf32>
      %c0_38 = arith.constant 0 : index
      %c0_39 = arith.constant 0 : index
      %45 = vector.load %arg13[%c0_38, %c0_39] : memref<1x128xf32, #tpu.memory_space<vmem>>, vector<1x128xf32>
      %46 = vector.broadcast %45 : vector<1x128xf32> to vector<2x128xf32>
      %47 = arith.addf %44, %46 : vector<2x128xf32>
      %cst_40 = arith.constant 0.000000e+00 : f32
      %48 = vector.broadcast %cst_40 : f32 to vector<2x128xf32>
      %49 = arith.maximumf %47, %48 : vector<2x128xf32>
      %c0_41 = arith.constant 0 : index
      %c0_42 = arith.constant 0 : index
      %50 = vector.load %arg14[%c0_41, %c0_42] : memref<128x128xf32, #tpu.memory_space<vmem>>, vector<128x128xf32>
      %cst_43 = arith.constant dense<0.000000e+00> : vector<2x128xf32>
      %51 = tpu.matmul %49, %50, %cst_43 {dimension_numbers = #tpu.dot_dimension_numbers<[1], [0], [0], [1], [0, 0, 1, 1], [], []>} : vector<2x128xf32>, vector<128x128xf32>, vector<2x128xf32> -> vector<2x128xf32>
      %c0_44 = arith.constant 0 : index
      %c0_45 = arith.constant 0 : index
      %52 = vector.load %arg15[%c0_44, %c0_45] : memref<2x128xf32, #tpu.memory_space<vmem>>, vector<2x128xf32>
      tpu.vector_store %arg15[%c0_44, %c0_45], %51 {strides = array<i32>} : memref<2x128xf32, #tpu.memory_space<vmem>>, vector<2x128xf32>,
    } else {
    }
    return
  }
  func.func @transform_0(%arg0: i32, %arg1: i32) -> (i32, i32) {
    %c0_i32 = arith.constant 0 : i32
    return %arg0, %arg1 : i32, i32
  }
  func.func @transform_1(%arg0: i32, %arg1: i32) -> (i32, i32) {
    %c0_i32 = arith.constant 0 : i32
    %c0_i32_0 = arith.constant 0 : i32
    return %arg0, %c0_i32 : i32, i32
  }
  func.func @transform_2(%arg0: i32, %arg1: i32) -> (i32, i32) {
    %c0_i32 = arith.constant 0 : i32
    %c0_i32_0 = arith.constant 0 : i32
    %c0_i32_1 = arith.constant 0 : i32
    return %c0_i32, %c0_i32_0 : i32, i32
  }
  func.func @transform_3(%arg0: i32, %arg1: i32) -> (i32, i32) {
    %c0_i32 = arith.constant 0 : i32
    %c0_i32_0 = arith.constant 0 : i32
    %c0_i32_1 = arith.constant 0 : i32
    return %c0_i32, %c0_i32_0 : i32, i32
  }
  func.func @transform_4(%arg0: i32, %arg1: i32) -> (i32, i32) {
    %c0_i32 = arith.constant 0 : i32
    %c0_i32_0 = arith.constant 0 : i32
    %c0_i32_1 = arith.constant 0 : i32
    return %c0_i32, %c0_i32_0 : i32, i32
  }
  func.func @transform_5(%arg0: i32, %arg1: i32) -> (i32, i32) {
    %c0_i32 = arith.constant 0 : i32
    %c0_i32_0 = arith.constant 0 : i32
    %c0_i32_1 = arith.constant 0 : i32
    return %c0_i32, %c0_i32_0 : i32, i32
  }
  func.func @transform_6(%arg0: i32, %arg1: i32) -> (i32, i32) {
    %c0_i32 = arith.constant 0 : i32
    %c0_i32_0 = arith.constant 0 : i32
    %c0_i32_1 = arith.constant 0 : i32
    return %c0_i32, %c0_i32_0 : i32, i32
  }
  func.func @transform_7(%arg0: i32, %arg1: i32) -> (i32, i32) {
    %c0_i32 = arith.constant 0 : i32
    %c0_i32_0 = arith.constant 0 : i32
    %c0_i32_1 = arith.constant 0 : i32
    return %c0_i32, %c0_i32_0 : i32, i32
  }
  func.func @transform_8(%arg0: i32, %arg1: i32) -> (i32, i32) {
    %c0_i32 = arith.constant 0 : i32
    %c0_i32_0 = arith.constant 0 : i32
    %c0_i32_1 = arith.constant 0 : i32
    return %c0_i32, %c0_i32_0 : i32, i32
  }
  func.func @transform_9(%arg0: i32, %arg1: i32) -> (i32, i32) {
    %c0_i32 = arith.constant 0 : i32
    %c0_i32_0 = arith.constant 0 : i32
    %c0_i32_1 = arith.constant 0 : i32
    return %c0_i32, %c0_i32_0 : i32, i32
  }
  func.func @transform_10(%arg0: i32, %arg1: i32) -> (i32, i32) {
    %c0_i32 = arith.constant 0 : i32
    %c0_i32_0 = arith.constant 0 : i32
    %c0_i32_1 = arith.constant 0 : i32
    return %c0_i32, %c0_i32_0 : i32, i32
  }
  func.func @transform_11(%arg0: i32, %arg1: i32) -> (i32, i32) {
    %c0_i32 = arith.constant 0 : i32
    %c0_i32_0 = arith.constant 0 : i32
    %c0_i32_1 = arith.constant 0 : i32
    return %c0_i32, %c0_i32_0 : i32, i32
  }
  func.func @transform_12(%arg0: i32, %arg1: i32) -> (i32, i32) {
    %c0_i32 = arith.constant 0 : i32
    %c0_i32_0 = arith.constant 0 : i32
    %c0_i32_1 = arith.constant 0 : i32
    return %c0_i32, %c0_i32_0 : i32, i32
  }
  func.func @transform_13(%arg0: i32, %arg1: i32) -> (i32, i32) {
    %c0_i32 = arith.constant 0 : i32
    %c0_i32_0 = arith.constant 0 : i32
    return %arg0, %c0_i32 : i32, i32
  }
}

</mosaic_0001>

<bundles_post_ra>
// kernel: tpu_custom_call.1
= control target key start
LH: loop header
LB: loop body
LE: loop exit
PB: predicated region body
PF: predicated region fallthrough
CT: control target
= control target key end

     0   :  { %18 = vsyncpa [#allocation4], 0  ;;  %s1386_s0 = inlined_call_operand.hbm [shape: bf16[6,256], index: 0, kind: input, shape index: {}]   ;;  %s1387_s1 = inlined_call_operand.hbm [shape: f32[2,128], index: 1, kind: input, shape index: {}]   ;;  %s1388_s2 = inlined_call_operand.hbm [shape: f32[2,6], index: 2, kind: input, shape index: {}]   ;;  %s1389_s3 = inlined_call_operand.hbm [shape: f32[6,1024], index: 3, kind: input, shape index: {}]   ;;  %s1390_s4 = inlined_call_operand.hbm [shape: f32[1,1024], index: 4, kind: input, shape index: {}]   ;;  %s1391_s5 = inlined_call_operand.hbm [shape: f32[128,128], index: 5, kind: input, shape index: {}]   ;;  %s1392_s6 = inlined_call_operand.vmem [shape: f32[1,128], index: 6, kind: input, shape index: {}]   ;;  %s1393_s7 = inlined_call_operand.hbm [shape: f32[128,128], index: 7, kind: input, shape index: {}]   ;;  %s1394_s8 = inlined_call_operand.vmem [shape: f32[1,128], index: 8, kind: input, shape index: {}]   ;;  %s1395_s9 = inlined_call_operand.hbm [shape: f32[1024,128], index: 9, kind: input, shape index: {}]   ;;  %s1396_s10 = inlined_call_operand.hbm [shape: f32[128,128], index: 10, kind: input, shape index: {}]   ;;  %s1397_s11 = inlined_call_operand.vmem [shape: f32[1,128], index: 11, kind: input, shape index: {}]   ;;  %s1398_s12 = inlined_call_operand.hbm [shape: f32[128,128], index: 12, kind: input, shape index: {}]   ;;  %s1399_s13 = inlined_call_operand.hbm [shape: f32[2,128], index: 13, kind: output, shape index: {}]  }
   0x1   :  { %19 = vsyncpa [#allocation7], 0 }
   0x2   :  { %20 = vsyncpa [#allocation10], 0 }
   0x3   :  { %21 = vsyncpa [#allocation13], 0 }
   0x4   :  { %22 = vsyncpa [#allocation16], 0 }
   0x5   :  { %23 = vsyncpa [#allocation19], 0  ;;  %s41_s27 = sshll.u32 %s1387_s1, 4  ;;  %s42_s27 = int_to_ptr.hbm [resolvable:$true] %s41_s27 }
   0x6   :  { %24 = vsyncpa [#allocation5], 0  ;;  %s1218_s28 = smov [#allocation6]   ;;  %s63_s15 = sshll.u32 %s1389_s3, 4  ;;  %s64_s15 = int_to_ptr.hbm [resolvable:$true] %s63_s15 }
   0x7   :  { %s43_s29 = sshll.u32 %s1218_s28, 4  ;;  %s1219_s16 = smov [#allocation9]   ;;  %s44_s29 = int_to_ptr.vmem [resolvable:$true] %s43_s29 }
   0x8   :  { %46 = dma.hbm_to_vmem [thread:$0]  %s42_s27, 32, %s44_s29, [#allocation7]  }
   0x9   :  { %s65_s17 = sshll.u32 %s1219_s16, 4  ;;  %s84_s20 = sshll.u32 %s1391_s5, 4  ;;  %s66_s17 = int_to_ptr.vmem [resolvable:$true] %s65_s17  ;;  %s85_s20 = int_to_ptr.hbm [resolvable:$true] %s84_s20 }
   0xa   :  { %68 = dma.hbm_to_vmem [thread:$0]  %s64_s15, 1024, %s66_s17, [#allocation10]  }
   0xb   :  { %s1220_s1 = smov [#allocation12]   ;;  %s114_s24 = sshll.u32 %s1395_s9, 4  ;;  %s115_s24 = int_to_ptr.hbm [resolvable:$true] %s114_s24 }
   0xc   :  { %s86_s21 = sshll.u32 %s1220_s1, 4  ;;  %s1221_s25 = smov 128   ;;  %s87_s21 = int_to_ptr.vmem [resolvable:$true] %s86_s21 }
   0xd   :  { %s1222_s3 = smov 8   ;;  %s1223_s26 = smov [#allocation15]  }
   0xe   :  { %92 = dma.hbm_to_vmem [thread:$0]  %s85_s20, 2048, %s87_s21, [#allocation13], %s1221_s25, %s1221_s25, %s1222_s3  }
   0xf   :  { %s116_s27 = sshll.u32 %s1223_s26, 4  ;;  %s30_s29 = sshll.u32 %s1386_s0, 4  ;;  %s117_s27 = int_to_ptr.vmem [resolvable:$true] %s116_s27  ;;  %s31_s29 = int_to_ptr.hbm [resolvable:$true] %s30_s29 }
  0x10   :  { %122 = dma.hbm_to_vmem [thread:$0]  %s115_s24, 16384, %s117_s27, [#allocation16], %s1221_s25, %s1221_s25, %s1222_s3  }
  0x11   :  { %s52_s14 = sshll.u32 %s1388_s2, 4  ;;  %s1224_s15 = smov [#allocation3]   ;;  %s53_s14 = int_to_ptr.hbm [resolvable:$true] %s52_s14 }
  0x12   :  { %s32_s16 = sshll.u32 %s1224_s15, 4  ;;  %s1225_s17 = smov [#allocation8]   ;;  %s33_s16 = int_to_ptr.vmem [resolvable:$true] %s32_s16 }
  0x13   :  { %35 = dma.hbm_to_vmem [thread:$0]  %s31_s29, 128, %s33_s16, [#allocation4]  }
  0x14   :  { %s54_s18 = sshll.u32 %s1225_s17, 4  ;;  %s74_s0 = sshll.u32 %s1390_s4, 4  ;;  %s55_s18 = int_to_ptr.vmem [resolvable:$true] %s54_s18  ;;  %s75_s0 = int_to_ptr.hbm [resolvable:$true] %s74_s0 }
  0x15   :  { %57 = dma.hbm_to_vmem [thread:$0]  %s53_s14, 32, %s55_s18, [#allocation7]  }
  0x16   :  { %s99_s22 = sshll.u32 %s1393_s7, 4  ;;  %s1226_s23 = smov [#allocation11]   ;;  %s100_s22 = int_to_ptr.hbm [resolvable:$true] %s99_s22 }
  0x17   :  { %s76_s2 = sshll.u32 %s1226_s23, 4  ;;  %s1227_s24 = smov [#allocation14]   ;;  %s77_s2 = int_to_ptr.vmem [resolvable:$true] %s76_s2 }
  0x18   :  { %79 = dma.hbm_to_vmem [thread:$0]  %s75_s0, 128, %s77_s2, [#allocation10]  }
  0x19   :  { %s101_s26 = sshll.u32 %s1227_s24, 4  ;;  %s127_s28 = sshll.u32 %s1396_s10, 4  ;;  %s102_s26 = int_to_ptr.vmem [resolvable:$true] %s101_s26  ;;  %s128_s28 = int_to_ptr.hbm [resolvable:$true] %s127_s28 }
  0x1a   :  { %107 = dma.hbm_to_vmem [thread:$0]  %s100_s22, 2048, %s102_s26, [#allocation13], %s1221_s25, %s1221_s25, %s1222_s3  }
  0x1b   :  { %s142_s7 = sshll.u32 %s1398_s12, 4  ;;  %s1228_s9 = smov [#allocation17]   ;;  %s143_s7 = int_to_ptr.hbm [resolvable:$true] %s142_s7 }
  0x1c   :  { %s129_s30 = sshll.u32 %s1228_s9, 4  ;;  %s1229_s14 = smov [#allocation18]   ;;  %s130_s30 = int_to_ptr.vmem [resolvable:$true] %s129_s30 }
  0x1d   :  { %135 = dma.hbm_to_vmem [thread:$0]  %s128_s28, 2048, %s130_s30, [#allocation16], %s1221_s25, %s1221_s25, %s1222_s3  }
  0x1e   :  { %s144_s10 = sshll.u32 %s1229_s14, 4  ;;  %s145_s10 = int_to_ptr.vmem [resolvable:$true] %s144_s10 }
  0x1f   :  { %150 = dma.hbm_to_vmem [thread:$0]  %s143_s7, 2048, %s145_s10, [#allocation19], %s1221_s25, %s1221_s25, %s1222_s3  }
  0x20   :  { %1204 = dma.done.wait [#allocation4], 128  }
  0x21   :  { %1205 = vsyncadd [#allocation4], 4294967168 }
  0x22   :  { %1206 = dma.done.wait [#allocation7], 64  }
  0x23   :  { %1207 = vsyncadd [#allocation7], 4294967232 }
  0x24   :  { %1208 = dma.done.wait [#allocation10], 1152  }
  0x25   :  { %1209 = vsyncadd [#allocation10], 4294966144 }
  0x26   :  { %1210 = dma.done.wait [#allocation13], 4096  }
  0x27   :  { %1211 = vsyncadd [#allocation13], 4294963200 }
  0x28   :  { %1212 = dma.done.wait [#allocation16], 18432  }
  0x29   :  { %1213 = vsyncadd [#allocation16], 4294948864 }
  0x2a   :  { %1214 = dma.done.wait [#allocation19], 2048  }
  0x2b   :  { %1215 = vsyncadd [#allocation19], 4294965248  ;;  %v1230_v0 = vmov 0.0   ;;  %v196_v1 = vld [vmem:[#allocation3] sm:$0x7]  ;;  %vm208_vm0 = vcmask 1045504  }
  0x2c   :  { %195 = vst [vmem:[#allocation2] sm:$0x3f] %v1230_v0  ;;  %v198_v2 = vld [vmem:[#allocation3 + $0x4] sm:$0x7]  ;;  %v197_v3 = vunpack.c.l.bf16 %v196_v1  ;;  %v213_v10 = vld [vmem:[#allocation9] sm:$0x3f] }
  0x2d   :  { %v199_v4 = vunpack.c.l.bf16 %v198_v2  ;;  %v214_v11 = vld [vmem:[#allocation9 + $0x8] sm:$0x3f]  ;;  %v215_v12 = vld [vmem:[#allocation9 + $0x10] sm:$0x3f]  ;;  %v216_v14 = vld [vmem:[#allocation9 + $0x18] sm:$0x3f] }
  0x2e   :  { %v217_v15 = vld [vmem:[#allocation9 + $0x20] sm:$0x3f]  ;;  %v218_v16 = vld [vmem:[#allocation9 + $0x28] sm:$0x3f]  ;;  %v219_v18 = vld [vmem:[#allocation9 + $0x30] sm:$0x3f] }
  0x2f   :  { %v200_v6 = vadd.f32 %v199_v4, %v197_v3  ;;  %v220_v19 = vld [vmem:[#allocation9 + $0x38] sm:$0x3f]  ;;  %v229_v28 = vld [vmem:[#allocation8] sm:$0x3]  ;;  %vm248_vm1 = vcmask 48128   ;;  %v452_v29 = vld [vmem:[#allocation12 + $0x78] sm:$0xff] }
  0x30   :  { %v451_v30 = vld [vmem:[#allocation12 + $0x70] sm:$0xff]  ;;  %v533_v31 = vld [vmem:[#allocation15 + $0x78] sm:$0xff]  ;;  %v450_v33 = vld [vmem:[#allocation12 + $0x68] sm:$0xff]  ;;  %s1231_s16 = smov [#allocation20]   ;;  %s892_s20 = sshll.u32 %s1399_s13, 4  ;;  %s893_s20 = int_to_ptr.hbm [resolvable:$true] %s892_s20 }
  0x31   :  { %v532_v32 = vld [vmem:[#allocation15 + $0x70] sm:$0xff]  ;;  %v531_v34 = vld [vmem:[#allocation15 + $0x68] sm:$0xff]  ;;  %v449_v35 = vld [vmem:[#allocation12 + $0x60] sm:$0xff]  ;;  %s890_s17 = sshll.u32 %s1231_s16, 4  ;;  %s891_s17 = int_to_ptr.vmem [resolvable:$true] %s890_s17 }
  0x32   :  { %v530_v36 = vld [vmem:[#allocation15 + $0x60] sm:$0xff]  ;;  %v448_v37 = vld [vmem:[#allocation12 + $0x58] sm:$0xff]  ;;  %v447_v39 = vld [vmem:[#allocation12 + $0x50] sm:$0xff] }
  0x33   :  { %v201_v5 = vld [vmem:[#allocation2] sm:$0x3f]  ;;  %v529_v38 = vld [vmem:[#allocation15 + $0x58] sm:$0xff]  ;;  %v528_v40 = vld [vmem:[#allocation15 + $0x50] sm:$0xff] }
  0x34   :  { %v202_v7 = vadd.f32 %v201_v5, %v200_v6  ;;  %v446_v41 = vld [vmem:[#allocation12 + $0x48] sm:$0xff]  ;;  %v445_v43 = vld [vmem:[#allocation12 + $0x40] sm:$0xff]  ;;  %v444_v45 = vld [vmem:[#allocation12 + $0x38] sm:$0xff] }
  0x35   :  { %v527_v42 = vld [vmem:[#allocation15 + $0x48] sm:$0xff]  ;;  %v526_v44 = vld [vmem:[#allocation15 + $0x40] sm:$0xff]  ;;  %v525_v46 = vld [vmem:[#allocation15 + $0x38] sm:$0xff] }
  0x36   :  { %203 = vst [vmem:[#allocation2] sm:$0x3f] %v202_v7  ;;  %v443_v47 = vld [vmem:[#allocation12 + $0x30] sm:$0xff]  ;;  %v442_v49 = vld [vmem:[#allocation12 + $0x28] sm:$0xff]  ;;  %v441_v51 = vld [vmem:[#allocation12 + $0x20] sm:$0xff] }
  0x37   :  { %v524_v48 = vld [vmem:[#allocation15 + $0x30] sm:$0xff]  ;;  %v523_v50 = vld [vmem:[#allocation15 + $0x28] sm:$0xff]  ;;  %v522_v52 = vld [vmem:[#allocation15 + $0x20] sm:$0xff] }
  0x38   :  { %v440_v53 = vld [vmem:[#allocation12 + $0x18] sm:$0xff]  ;;  %v439_v55 = vld [vmem:[#allocation12 + $0x10] sm:$0xff]  ;;  %v438_v57 = vld [vmem:[#allocation12 + $0x8] sm:$0xff] }
  0x39   :  { %v521_v54 = vld [vmem:[#allocation15 + $0x18] sm:$0xff]  ;;  %v520_v56 = vld [vmem:[#allocation15 + $0x10] sm:$0xff]  ;;  %v519_v58 = vld [vmem:[#allocation15 + $0x8] sm:$0xff] }
  0x3a   :  { %v437_v59 = vld [vmem:[#allocation12] sm:$0xff]  ;;  %v436_v61 = vld [vmem:[#allocation6] sm:$0x3]  ;;  %v597_v62 = vld [vmem:[#allocation15 + $0x278] sm:$0xff] }
  0x3b   :  { %v518_v60 = vld [vmem:[#allocation15] sm:$0xff]  ;;  %v596_v63 = vld [vmem:[#allocation15 + $0x270] sm:$0xff]  ;;  %v595_v0 = vld [vmem:[#allocation15 + $0x268] sm:$0xff] }
  0x3c   :  { %v594_v1 = vld [vmem:[#allocation15 + $0x260] sm:$0xff]  ;;  %v593_v2 = vld [vmem:[#allocation15 + $0x258] sm:$0xff]  ;;  %v592_v4 = vld [vmem:[#allocation15 + $0x250] sm:$0xff] }
  0x3d   :  { %v207_v8 = vld [vmem:[#allocation2] sm:$0x3f]  ;;  %v493_v3 = vld [vmem:[#allocation14 + $0x78] sm:$0xff]  ;;  %v492_v5 = vld [vmem:[#allocation14 + $0x70] sm:$0xff] }
  0x3e   :  { %v209_v9 = vsel %vm208_vm0, %v207_v8, 0.0  ;;  %v591_v6 = vld [vmem:[#allocation15 + $0x248] sm:$0xff]  ;;  %v590_v8 = vld [vmem:[#allocation15 + $0x240] sm:$0xff] }
  0x3f   :  { %210 = vadd.xlane.f32.xlu0 %v209_v9  ;;  %v491_v7 = vld [vmem:[#allocation14 + $0x68] sm:$0xff]  ;;  %v490_v9 = vld [vmem:[#allocation14 + $0x60] sm:$0xff] }
  0xb2   :  { %v211_v13 = vpop.xlane.xlu0 %210 }
  0xb3   :  { %v212_v17 = vmul.f32 0.00390625, %v211_v13  ;;  %v488_v13 = vld [vmem:[#allocation14 + $0x50] sm:$0xff] }
  0xb5   :  { %v221_v20 = vmul.f32 %v213_v10, %v212_v17  ;;  %v222_v21 = vmul.f32 %v214_v11, %v212_v17  ;;  %v223_v22 = vmul.f32 %v215_v12, %v212_v17  ;;  %v224_v23 = vmul.f32 %v216_v14, %v212_v17  ;;  %v589_v10 = vld [vmem:[#allocation15 + $0x238] sm:$0xff]  ;;  %v588_v12 = vld [vmem:[#allocation15 + $0x230] sm:$0xff]  ;;  %v587_v14 = vld [vmem:[#allocation15 + $0x228] sm:$0xff] }
  0xb6   :  { %v225_v24 = vmul.f32 %v217_v15, %v212_v17  ;;  %v226_v25 = vmul.f32 %v218_v16, %v212_v17  ;;  %v227_v26 = vmul.f32 %v219_v18, %v212_v17  ;;  %v228_v27 = vmul.f32 %v220_v19, %v212_v17  ;;  %v489_v11 = vld [vmem:[#allocation14 + $0x58] sm:$0xff]  ;;  %v487_v15 = vld [vmem:[#allocation14 + $0x48] sm:$0xff]  ;;  %v586_v16 = vld [vmem:[#allocation15 + $0x220] sm:$0xff] }
  0xb7   :  { %907 = vmatpush.msk.msra.mxu0 %vm208_vm0, %v221_v20  ;;  %909 = vmatpush.msk.msra.mxu1 %vm208_vm0, %v222_v21  ;;  %v486_v17 = vld [vmem:[#allocation14 + $0x40] sm:$0xff]  ;;  %v585_v18 = vld [vmem:[#allocation15 + $0x218] sm:$0xff]  ;;  %v584_v20 = vld [vmem:[#allocation15 + $0x210] sm:$0xff] }
  0xb8   :  { %911 = vmatpush.msk.msra.mxu2 %vm208_vm0, %v223_v22  ;;  %913 = vmatpush.msk.msra.mxu3 %vm208_vm0, %v224_v23  ;;  %v485_v19 = vld [vmem:[#allocation14 + $0x38] sm:$0xff]  ;;  %v484_v21 = vld [vmem:[#allocation14 + $0x30] sm:$0xff]  ;;  %v583_v22 = vld [vmem:[#allocation15 + $0x208] sm:$0xff] }
  0xb9   :  { %915 = vmatpush.msk.msrb.mxu0 %vm208_vm0, %v225_v24  ;;  %917 = vmatpush.msk.msrb.mxu1 %vm208_vm0, %v226_v25  ;;  %v483_v23 = vld [vmem:[#allocation14 + $0x28] sm:$0xff]  ;;  %v582_v24 = vld [vmem:[#allocation15 + $0x200] sm:$0xff] }
  0xba   :  { %919 = vmatpush.msk.msrb.mxu2 %vm208_vm0, %v227_v26  ;;  %921 = vmatpush.msk.msrb.mxu3 %vm208_vm0, %v228_v27  ;;  %v482_v25 = vld [vmem:[#allocation14 + $0x20] sm:$0xff]  ;;  %v481_v26 = vld [vmem:[#allocation14 + $0x18] sm:$0xff] }
  0xbb   :  { %908 = vmatmul.msk.f32.vlgmr.msra.gmra.mxu0 %vm248_vm1, %v229_v28  ;;  %914 = vmatmul.msk.f32.vlgmr.msra.gmra.mxu3 %vm248_vm1, %v229_v28  ;;  %v1364_v27 = vld [vmem:[#allocation11] sm:$0xff] }
  0xbc   :  { %457 = vmatpush.msra.mxu0 %v452_v29  ;;  %682 = vmatpush.msra.mxu3 %v533_v31  ;;  %v480_v29 = vld [vmem:[#allocation14 + $0x10] sm:$0xff] }
  0xbd   :  { %910 = vmatmul.msk.f32.vlgmr.msra.gmra.mxu1 %vm248_vm1, %v229_v28  ;;  %912 = vmatmul.msk.f32.vlgmr.msra.gmra.mxu2 %vm248_vm1, %v229_v28 }
  0xbe   :  { %458 = vmatpush.msra.mxu0 %v451_v30  ;;  %683 = vmatpush.msra.mxu3 %v532_v32  ;;  %v479_v32 = vld [vmem:[#allocation14 + $0x8] sm:$0xff] }
  0xbf   :  { %498 = vmatpush.msra.mxu1 %v493_v3  ;;  %v537_v3 = vld [vmem:[#allocation15 + $0x98] sm:$0xff] }
  0xc0   :  { %459 = vmatpush.msra.mxu0 %v450_v33  ;;  %684 = vmatpush.msra.mxu3 %v531_v34  ;;  %v478_v33 = vld [vmem:[#allocation14] sm:$0xff]  ;;  %v236_v34 = vperm.slane %v1364_v27, 4 }
  0xc1   :  { %499 = vmatpush.msra.mxu1 %v492_v5  ;;  %v937_v5 = vld [vmem:[%s1392_s6] ss:$0 sm:$0xff] }
  0xc2   :  { %460 = vmatpush.msra.mxu0 %v449_v35  ;;  %685 = vmatpush.msra.mxu3 %v530_v36  ;;  %v549_v35 = vld [vmem:[#allocation15 + $0xf8] sm:$0xff]  ;;  %v548_v36 = vld [vmem:[#allocation15 + $0xf0] sm:$0xff] }
  0xc3   :  { %916 = vmatmul.msk.f32.vlgmr.msrb.gmra.mxu0 %vm248_vm1, %v229_v28  ;;  %922 = vmatmul.msk.f32.vlgmr.msrb.gmra.mxu3 %vm248_vm1, %v229_v28 }
  0xc4   :  { %461 = vmatpush.msra.mxu0 %v448_v37  ;;  %686 = vmatpush.msra.mxu3 %v529_v38  ;;  %v661_v37 = vld [vmem:[#allocation17 + $0x78] sm:$0xff]  ;;  %v547_v38 = vld [vmem:[#allocation15 + $0xe8] sm:$0xff] }
  0xc5   :  { %918 = vmatmul.msk.f32.vlgmr.msrb.gmra.mxu1 %vm248_vm1, %v229_v28  ;;  %920 = vmatmul.msk.f32.vlgmr.msrb.gmra.mxu2 %vm248_vm1, %v229_v28  ;;  %v232_v28 = vperm.slane %v1364_v27, 0 }
  0xc6   :  { %462 = vmatpush.msra.mxu0 %v447_v39  ;;  %687 = vmatpush.msra.mxu3 %v528_v40  ;;  %v660_v39 = vld [vmem:[#allocation17 + $0x70] sm:$0xff] }
  0xc7   :  { %500 = vmatpush.msra.mxu1 %v491_v7  ;;  %662 = vmatpush.msra.mxu2 %v661_v37  ;;  %v648_v7 = vld [vmem:[#allocation17 + $0x10] sm:$0xff]  ;;  %v555_v37 = vld [vmem:[#allocation15 + $0x128] sm:$0xff] }
  0xc8   :  { %463 = vmatpush.msra.mxu0 %v446_v41  ;;  %688 = vmatpush.msra.mxu3 %v527_v42  ;;  %v659_v41 = vld [vmem:[#allocation17 + $0x68] sm:$0xff] }
  0xc9   :  { %501 = vmatpush.msra.mxu1 %v490_v9  ;;  %663 = vmatpush.msra.mxu2 %v660_v39  ;;  %v535_v9 = vld [vmem:[#allocation15 + $0x88] sm:$0xff]  ;;  %v604_v39 = vld [vmem:[#allocation15 + $0x2b0] sm:$0xff] }
  0xca   :  { %464 = vmatpush.msra.mxu0 %v445_v43  ;;  %689 = vmatpush.msra.mxu3 %v526_v44  ;;  %v546_v43 = vld [vmem:[#allocation15 + $0xe0] sm:$0xff] }
  0xcb   :  { %502 = vmatpush.msra.mxu1 %v489_v11  ;;  %v658_v44 = vld [vmem:[#allocation17 + $0x60] sm:$0xff]  ;;  %664 = vmatpush.msra.mxu2 %v659_v41  ;;  %v575_v41 = vld [vmem:[#allocation15 + $0x1c8] sm:$0xff] }
  0xcc   :  { %465 = vmatpush.msra.mxu0 %v444_v45  ;;  %690 = vmatpush.msra.mxu3 %v525_v46  ;;  %v545_v45 = vld [vmem:[#allocation15 + $0xd8] sm:$0xff] }
  0xcd   :  { %503 = vmatpush.msra.mxu1 %v488_v13  ;;  %v657_v46 = vld [vmem:[#allocation17 + $0x58] sm:$0xff]  ;;  %665 = vmatpush.msra.mxu2 %v658_v44  ;;  %v574_v44 = vld [vmem:[#allocation15 + $0x1c0] sm:$0xff] }
  0xce   :  { %466 = vmatpush.msra.mxu0 %v443_v47  ;;  %691 = vmatpush.msra.mxu3 %v524_v48  ;;  %v544_v47 = vld [vmem:[#allocation15 + $0xd0] sm:$0xff]  ;;  %v565_v48 = vld [vmem:[#allocation15 + $0x178] sm:$0xff] }
  0xcf   :  { %504 = vmatpush.msra.mxu1 %v487_v15  ;;  %666 = vmatpush.msra.mxu2 %v657_v46  ;;  %v613_v15 = vld [vmem:[#allocation15 + $0x2f8] sm:$0xff]  ;;  %v552_v46 = vld [vmem:[#allocation15 + $0x110] sm:$0xff] }
  0xd0   :  { %467 = vmatpush.msra.mxu0 %v442_v49  ;;  %692 = vmatpush.msra.mxu3 %v523_v50  ;;  %v656_v49 = vld [vmem:[#allocation17 + $0x50] sm:$0xff] }
  0xd1   :  { %505 = vmatpush.msra.mxu1 %v486_v17  ;;  %v564_v50 = vld [vmem:[#allocation15 + $0x170] sm:$0xff]  ;;  %667 = vmatpush.msra.mxu2 %v656_v49  ;;  %v551_v49 = vld [vmem:[#allocation15 + $0x108] sm:$0xff] }
  0xd2   :  { %468 = vmatpush.msra.mxu0 %v441_v51  ;;  %693 = vmatpush.msra.mxu3 %v522_v52  ;;  %v543_v51 = vld [vmem:[#allocation15 + $0xc8] sm:$0xff] }
  0xd3   :  { %506 = vmatpush.msra.mxu1 %v485_v19  ;;  %v563_v52 = vld [vmem:[#allocation15 + $0x168] sm:$0xff]  ;;  %v612_v19 = vld [vmem:[#allocation15 + $0x2f0] sm:$0xff] }
  0xd4   :  { %469 = vmatpush.msra.mxu0 %v440_v53  ;;  %694 = vmatpush.msra.mxu3 %v521_v54  ;;  %v655_v53 = vld [vmem:[#allocation17 + $0x48] sm:$0xff]  ;;  %v542_v54 = vld [vmem:[#allocation15 + $0xc0] sm:$0xff] }
  0xd5   :  { %507 = vmatpush.msra.mxu1 %v484_v21  ;;  %668 = vmatpush.msra.mxu2 %v655_v53  ;;  %v611_v21 = vld [vmem:[#allocation15 + $0x2e8] sm:$0xff]  ;;  %v550_v53 = vld [vmem:[#allocation15 + $0x100] sm:$0xff] }
  0xd6   :  { %470 = vmatpush.msra.mxu0 %v439_v55  ;;  %695 = vmatpush.msra.mxu3 %v520_v56  ;;  %v562_v55 = vld [vmem:[#allocation15 + $0x160] sm:$0xff] }
  0xd7   :  { %508 = vmatpush.msra.mxu1 %v483_v23  ;;  %v654_v56 = vld [vmem:[#allocation17 + $0x40] sm:$0xff]  ;;  %v609_v23 = vld [vmem:[#allocation15 + $0x2d8] sm:$0xff] }
  0xd8   :  { %471 = vmatpush.msra.mxu0 %v438_v57  ;;  %696 = vmatpush.msra.mxu3 %v519_v58  ;;  %v541_v57 = vld [vmem:[#allocation15 + $0xb8] sm:$0xff] }
  0xd9   :  { %509 = vmatpush.msra.mxu1 %v482_v25  ;;  %v561_v58 = vld [vmem:[#allocation15 + $0x158] sm:$0xff]  ;;  %669 = vmatpush.msra.mxu2 %v654_v56  ;;  %v580_v25 = vld [vmem:[#allocation15 + $0x1f0] sm:$0xff]  ;;  %v599_v56 = vld [vmem:[#allocation15 + $0x288] sm:$0xff] }
  0xda   :  { %472 = vmatpush.msra.mxu0 %v437_v59  ;;  %697 = vmatpush.msra.mxu3 %v518_v60  ;;  %v653_v59 = vld [vmem:[#allocation17 + $0x38] sm:$0xff]  ;;  %v540_v60 = vld [vmem:[#allocation15 + $0xb0] sm:$0xff] }
  0xdb   :  { %473 = vmatmul.f32.vlgmr.msra.gmra.mxu0 %v436_v61  ;;  %510 = vmatpush.msra.mxu1 %v481_v26  ;;  %v560_v61 = vld [vmem:[#allocation15 + $0x150] sm:$0xff] }
  0xdc   :  { %762 = vmatpush.msrb.mxu3 %v597_v62  ;;  %702 = vmatpush.msrb.mxu0 %v549_v35  ;;  %v652_v62 = vld [vmem:[#allocation17 + $0x30] sm:$0xff]  ;;  %v577_v35 = vld [vmem:[#allocation15 + $0x1d8] sm:$0xff] }
  0xdd   :  { %511 = vmatpush.msra.mxu1 %v480_v29  ;;  %670 = vmatpush.msra.mxu2 %v653_v59  ;;  %v608_v26 = vld [vmem:[#allocation15 + $0x2d0] sm:$0xff]  ;;  %v579_v29 = vld [vmem:[#allocation15 + $0x1e8] sm:$0xff] }
  0xde   :  { %763 = vmatpush.msrb.mxu3 %v596_v63  ;;  %703 = vmatpush.msrb.mxu0 %v548_v36  ;;  %v539_v63 = vld [vmem:[#allocation15 + $0xa8] sm:$0xff]  ;;  %v605_v36 = vld [vmem:[#allocation15 + $0x2b8] sm:$0xff] }
  0xdf   :  { %512 = vmatpush.msra.mxu1 %v479_v32  ;;  %671 = vmatpush.msra.mxu2 %v652_v62  ;;  %v578_v32 = vld [vmem:[#allocation15 + $0x1e0] sm:$0xff]  ;;  %v569_v62 = vld [vmem:[#allocation15 + $0x198] sm:$0xff] }
  0xe0   :  { %764 = vmatpush.msrb.mxu3 %v595_v0  ;;  %704 = vmatpush.msrb.mxu0 %v547_v38  ;;  %v651_v0 = vld [vmem:[#allocation17 + $0x28] sm:$0xff]  ;;  %v576_v38 = vld [vmem:[#allocation15 + $0x1d0] sm:$0xff] }
  0xe1   :  { %513 = vmatpush.msra.mxu1 %v478_v33  ;;  %672 = vmatpush.msra.mxu2 %v651_v0  ;;  %v606_v33 = vld [vmem:[#allocation15 + $0x2c0] sm:$0xff]  ;;  %v568_v0 = vld [vmem:[#allocation15 + $0x190] sm:$0xff] }
  0xe2   :  { %765 = vmatpush.msrb.mxu3 %v594_v1  ;;  %705 = vmatpush.msrb.mxu0 %v546_v43  ;;  %v538_v1 = vld [vmem:[#allocation15 + $0xa0] sm:$0xff]  ;;  %v553_v43 = vld [vmem:[#allocation15 + $0x118] sm:$0xff] }
  0xe3   :  { %722 = vmatpush.msrb.mxu1 %v565_v48  ;;  %v601_v48 = vld [vmem:[#allocation15 + $0x298] sm:$0xff] }
  0xe4   :  { %766 = vmatpush.msrb.mxu3 %v593_v2  ;;  %706 = vmatpush.msrb.mxu0 %v545_v45  ;;  %v650_v2 = vld [vmem:[#allocation17 + $0x20] sm:$0xff] }
  0xe5   :  { %723 = vmatpush.msrb.mxu1 %v564_v50  ;;  %673 = vmatpush.msra.mxu2 %v650_v2  ;;  %v602_v45 = vld [vmem:[#allocation15 + $0x2a0] sm:$0xff]  ;;  %v572_v50 = vld [vmem:[#allocation15 + $0x1b0] sm:$0xff]  ;;  %v567_v2 = vld [vmem:[#allocation15 + $0x188] sm:$0xff] }
  0xe6   :  { %767 = vmatpush.msrb.mxu3 %v592_v4  ;;  %707 = vmatpush.msrb.mxu0 %v544_v47  ;;  %v649_v4 = vld [vmem:[#allocation17 + $0x18] sm:$0xff] }
  0xe7   :  { %724 = vmatpush.msrb.mxu1 %v563_v52  ;;  %674 = vmatpush.msra.mxu2 %v649_v4  ;;  %v573_v47 = vld [vmem:[#allocation15 + $0x1b8] sm:$0xff]  ;;  %v237_v52 = vperm.slane %v1364_v27, 5  ;;  %v566_v4 = vld [vmem:[#allocation15 + $0x180] sm:$0xff] }
  0xe8   :  { %768 = vmatpush.msrb.mxu3 %v591_v6  ;;  %708 = vmatpush.msrb.mxu0 %v543_v51  ;;  %v536_v6 = vld [vmem:[#allocation15 + $0x90] sm:$0xff] }
  0xe9   :  { %725 = vmatpush.msrb.mxu1 %v562_v55  ;;  %675 = vmatpush.msra.mxu2 %v648_v7  ;;  %v600_v51 = vld [vmem:[#allocation15 + $0x290] sm:$0xff]  ;;  %v571_v55 = vld [vmem:[#allocation15 + $0x1a8] sm:$0xff]  ;;  %v622_v7 = vld [vmem:[#allocation15 + $0x340] sm:$0xff] }
  0xea   :  { %769 = vmatpush.msrb.mxu3 %v590_v8  ;;  %709 = vmatpush.msrb.mxu0 %v542_v54  ;;  %v233_v8 = vperm.slane %v1364_v27, 1 }
  0xeb   :  { %726 = vmatpush.msrb.mxu1 %v561_v58  ;;  %v570_v58 = vld [vmem:[#allocation15 + $0x1a0] sm:$0xff] }
  0xec   :  { %770 = vmatpush.msrb.mxu3 %v589_v10  ;;  %710 = vmatpush.msrb.mxu0 %v541_v57  ;;  %v629_v57 = vld [vmem:[#allocation15 + $0x378] sm:$0xff] }
  0xed   :  { %727 = vmatpush.msrb.mxu1 %v560_v61  ;;  %v628_v61 = vld [vmem:[#allocation15 + $0x370] sm:$0xff] }
  0xee   :  { %771 = vmatpush.msrb.mxu3 %v588_v12  ;;  %711 = vmatpush.msrb.mxu0 %v540_v60  ;;  %v647_v12 = vld [vmem:[#allocation17 + $0x8] sm:$0xff]  ;;  %v598_v60 = vld [vmem:[#allocation15 + $0x280] sm:$0xff] }
  0xef   :  { %676 = vmatpush.msra.mxu2 %v647_v12 }
  0xf0   :  { %772 = vmatpush.msrb.mxu3 %v587_v14  ;;  %712 = vmatpush.msrb.mxu0 %v539_v63  ;;  %v534_v14 = vld [vmem:[#allocation15 + $0x80] sm:$0xff]  ;;  %v627_v63 = vld [vmem:[#allocation15 + $0x368] sm:$0xff] }
  0xf2   :  { %773 = vmatpush.msrb.mxu3 %v586_v16  ;;  %713 = vmatpush.msrb.mxu0 %v538_v1  ;;  %v626_v1 = vld [vmem:[#allocation15 + $0x360] sm:$0xff] }
  0xf4   :  { %774 = vmatpush.msrb.mxu3 %v585_v18  ;;  %714 = vmatpush.msrb.mxu0 %v537_v3  ;;  %v646_v18 = vld [vmem:[#allocation17] sm:$0xff]  ;;  %v625_v3 = vld [vmem:[#allocation15 + $0x358] sm:$0xff] }
  0xf5   :  { %677 = vmatpush.msra.mxu2 %v646_v18 }
  0xf6   :  { %775 = vmatpush.msrb.mxu3 %v584_v20  ;;  %715 = vmatpush.msrb.mxu0 %v536_v6  ;;  %v581_v20 = vld [vmem:[#allocation15 + $0x1f8] sm:$0xff]  ;;  %v623_v6 = vld [vmem:[#allocation15 + $0x348] sm:$0xff] }
  0xf7   :  { %742 = vmatpush.msrb.mxu2 %v581_v20 }
  0xf8   :  { %776 = vmatpush.msrb.mxu3 %v583_v22  ;;  %716 = vmatpush.msrb.mxu0 %v535_v9  ;;  %v610_v22 = vld [vmem:[#allocation15 + $0x2e0] sm:$0xff]  ;;  %v234_v9 = vperm.slane %v1364_v27, 2 }
  0xf9   :  { %743 = vmatpush.msrb.mxu2 %v580_v25  ;;  %v645_v25 = vld [vmem:[#allocation15 + $0x3f8] sm:$0xff] }
  0xfa   :  { %777 = vmatpush.msrb.mxu3 %v582_v24  ;;  %717 = vmatpush.msrb.mxu0 %v534_v14  ;;  %v559_v24 = vld [vmem:[#allocation15 + $0x148] sm:$0xff]  ;;  %v618_v14 = vld [vmem:[#allocation15 + $0x320] sm:$0xff] }
  0xfb   :  { %728 = vmatpush.msrb.mxu1 %v559_v24  ;;  %744 = vmatpush.msrb.mxu2 %v579_v29  ;;  %v643_v29 = vld [vmem:[#allocation15 + $0x3e8] sm:$0xff] }
  0xfc   :  { %782 = vmatpush.msra.mxu0 %v613_v15  ;;  %v617_v15 = vld [vmem:[#allocation15 + $0x318] sm:$0xff] }
  0xfd   :  { %745 = vmatpush.msrb.mxu2 %v578_v32  ;;  %v642_v32 = vld [vmem:[#allocation15 + $0x3e0] sm:$0xff] }
  0xfe   :  { %783 = vmatpush.msra.mxu0 %v612_v19  ;;  %v615_v19 = vld [vmem:[#allocation15 + $0x308] sm:$0xff] }
  0xff   :  { %746 = vmatpush.msrb.mxu2 %v577_v35  ;;  %v639_v35 = vld [vmem:[#allocation15 + $0x3c8] sm:$0xff] }
 0x100   :  { %784 = vmatpush.msra.mxu0 %v611_v21  ;;  %v614_v21 = vld [vmem:[#allocation15 + $0x300] sm:$0xff] }
 0x101   :  { %747 = vmatpush.msrb.mxu2 %v576_v38  ;;  %v636_v38 = vld [vmem:[#allocation15 + $0x3b0] sm:$0xff] }
 0x102   :  { %785 = vmatpush.msra.mxu0 %v610_v22  ;;  %v938_v22 = vld [vmem:[%s1394_s8] ss:$0 sm:$0xff] }
 0x103   :  { %748 = vmatpush.msrb.mxu2 %v575_v41  ;;  %v633_v41 = vld [vmem:[#allocation15 + $0x398] sm:$0xff] }
 0x104   :  { %786 = vmatpush.msra.mxu0 %v609_v23 }
 0x105   :  { %749 = vmatpush.msrb.mxu2 %v574_v44  ;;  %v631_v44 = vld [vmem:[#allocation15 + $0x388] sm:$0xff] }
 0x106   :  { %787 = vmatpush.msra.mxu0 %v608_v26  ;;  %v235_v26 = vperm.slane %v1364_v27, 3 }
 0x107   :  { %750 = vmatpush.msrb.mxu2 %v573_v47  ;;  %v630_v47 = vld [vmem:[#allocation15 + $0x380] sm:$0xff] }
 0x109   :  { %751 = vmatpush.msrb.mxu2 %v572_v50  ;;  %v861_v50 = vld [vmem:[#allocation18 + $0x68] sm:$0xff] }
 0x10b   :  { %752 = vmatpush.msrb.mxu2 %v571_v55  ;;  %v855_v55 = vld [vmem:[#allocation18 + $0x38] sm:$0xff] }
 0x10d   :  { %753 = vmatpush.msrb.mxu2 %v570_v58  ;;  %v852_v58 = vld [vmem:[#allocation18 + $0x20] sm:$0xff] }
 0x10f   :  { %754 = vmatpush.msrb.mxu2 %v569_v62  ;;  %v848_v62 = vld [vmem:[#allocation18] sm:$0xff] }
 0x111   :  { %755 = vmatpush.msrb.mxu2 %v568_v0 }
 0x113   :  { %756 = vmatpush.msrb.mxu2 %v567_v2 }
 0x115   :  { %757 = vmatpush.msrb.mxu2 %v566_v4 }
 0x138   :  { %v293_v30 = vpop.f32.mrf.mxu0 }
 0x139   :  { %v294_v31 = vadd.f32 %v293_v30, %v232_v28  ;;  %v558_v28 = vld [vmem:[#allocation15 + $0x140] sm:$0xff]  ;;  %v607_v30 = vld [vmem:[#allocation15 + $0x2c8] sm:$0xff] }
 0x13a   :  { %v313_v10 = vpop.f32.mrf.mxu1  ;;  %729 = vmatpush.msrb.mxu1 %v558_v28  ;;  %788 = vmatpush.msra.mxu0 %v607_v30  ;;  %v644_v28 = vld [vmem:[#allocation15 + $0x3f0] sm:$0xff] }
 0x13b   :  { %698 = vmatmul.f32.vlgmr.msra.gmra.mxu3 %v294_v31  ;;  %v314_v16 = vadd.f32 %v313_v10, %v233_v8  ;;  %v557_v31 = vld [vmem:[#allocation15 + $0x138] sm:$0xff] }
 0x13c   :  { %730 = vmatpush.msrb.mxu1 %v557_v31  ;;  %789 = vmatpush.msra.mxu0 %v606_v33  ;;  %v621_v8 = vld [vmem:[#allocation15 + $0x338] sm:$0xff] }
 0x13d   :  { %718 = vmatmul.f32.vlgmr.msrb.gmra.mxu0 %v314_v16  ;;  %v616_v16 = vld [vmem:[#allocation15 + $0x310] sm:$0xff]  ;;  %v641_v33 = vld [vmem:[#allocation15 + $0x3d8] sm:$0xff] }
 0x13e   :  { %790 = vmatpush.msra.mxu0 %v605_v36  ;;  %v353_v30 = vpop.f32.mrf.mxu3  ;;  %v638_v36 = vld [vmem:[#allocation15 + $0x3c0] sm:$0xff] }
 0x13f   :  { %v354_v31 = vadd.f32 %v353_v30, %v235_v26 }
 0x140   :  { %v373_v40 = vpop.f32.mrf.mxu0  ;;  %791 = vmatpush.msra.mxu0 %v604_v39  ;;  %v333_v10 = vpop.f32.mrf.mxu2  ;;  %v635_v39 = vld [vmem:[#allocation15 + $0x3a8] sm:$0xff] }
 0x141   :  { %v374_v42 = vadd.f32 %v373_v40, %v236_v34  ;;  %v556_v34 = vld [vmem:[#allocation15 + $0x130] sm:$0xff]  ;;  %v554_v40 = vld [vmem:[#allocation15 + $0x120] sm:$0xff]  ;;  %v334_v12 = vadd.f32 %v333_v10, %v234_v9 }
 0x142   :  { %731 = vmatpush.msrb.mxu1 %v556_v34  ;;  %v393_v54 = vpop.f32.mrf.mxu1  ;;  %v640_v34 = vld [vmem:[#allocation15 + $0x3d0] sm:$0xff] }
 0x143   :  { %778 = vmatmul.f32.vlgmr.msrb.gmra.mxu3 %v374_v42  ;;  %v603_v42 = vld [vmem:[#allocation15 + $0x2a8] sm:$0xff]  ;;  %v394_v59 = vadd.f32 %v393_v54, %v237_v52  ;;  %v859_v52 = vld [vmem:[#allocation18 + $0x58] sm:$0xff]  ;;  %v856_v54 = vld [vmem:[#allocation18 + $0x40] sm:$0xff] }
 0x144   :  { %732 = vmatpush.msrb.mxu1 %v555_v37  ;;  %792 = vmatpush.msra.mxu0 %v603_v42  ;;  %v637_v37 = vld [vmem:[#allocation15 + $0x3b8] sm:$0xff]  ;;  %v239_v42 = vperm.slane %v1364_v27, 7 }
 0x146   :  { %733 = vmatpush.msrb.mxu1 %v554_v40  ;;  %793 = vmatpush.msra.mxu0 %v602_v45  ;;  %v634_v40 = vld [vmem:[#allocation15 + $0x3a0] sm:$0xff]  ;;  %v433_v45 = vpop.f32.mrf.mxu3 }
 0x148   :  { %734 = vmatpush.msrb.mxu1 %v553_v43  ;;  %794 = vmatpush.msra.mxu0 %v601_v48  ;;  %v413_v18 = vpop.f32.mrf.mxu2  ;;  %v632_v43 = vld [vmem:[#allocation15 + $0x390] sm:$0xff]  ;;  %v863_v48 = vld [vmem:[#allocation18 + $0x78] sm:$0xff] }
 0x149   :  { %864 = vmatpush.msra.mxu3 %v863_v48 }
 0x14a   :  { %735 = vmatpush.msrb.mxu1 %v552_v46  ;;  %795 = vmatpush.msra.mxu0 %v600_v51  ;;  %v434_v46 = vadd.f32 %v433_v45, %v239_v42  ;;  %v860_v51 = vld [vmem:[#allocation18 + $0x60] sm:$0xff] }
 0x14c   :  { %736 = vmatpush.msrb.mxu1 %v551_v49  ;;  %796 = vmatpush.msra.mxu0 %v599_v56  ;;  %v862_v49 = vld [vmem:[#allocation18 + $0x70] sm:$0xff] }
 0x14d   :  { %865 = vmatpush.msra.mxu3 %v862_v49  ;;  %v854_v56 = vld [vmem:[#allocation18 + $0x30] sm:$0xff] }
 0x14e   :  { %737 = vmatpush.msrb.mxu1 %v550_v53  ;;  %797 = vmatpush.msra.mxu0 %v598_v60  ;;  %v857_v53 = vld [vmem:[#allocation18 + $0x48] sm:$0xff]  ;;  %v850_v60 = vld [vmem:[#allocation18 + $0x10] sm:$0xff] }
 0x14f   :  { %798 = vmatmul.f32.vlgmr.msra.gmra.mxu0 %v394_v59  ;;  %866 = vmatpush.msra.mxu3 %v861_v50  ;;  %v851_v59 = vld [vmem:[#allocation18 + $0x18] sm:$0xff] }
 0x151   :  { %867 = vmatpush.msra.mxu3 %v860_v51 }
 0x153   :  { %868 = vmatpush.msra.mxu3 %v859_v52 }
 0x158   :  { %v474_v11 = vpop.f32.mrf.mxu0 }
 0x159   :  { %v475_v13 = vadd.f32 %v937_v5, %v474_v11  ;;  %v624_v5 = vld [vmem:[#allocation15 + $0x350] sm:$0xff] }
 0x15a   :  { %v620_v11 = vld [vmem:[#allocation15 + $0x330] sm:$0xff] }
 0x15b   :  { %v477_v17 = vmax.f32 %v475_v13, 0.0  ;;  %v619_v13 = vld [vmem:[#allocation15 + $0x328] sm:$0xff] }
 0x15d   :  { %514 = vmatmul.f32.vlgmr.msra.gmra.mxu1 %v477_v17  ;;  %v238_v17 = vperm.slane %v1364_v27, 6  ;;  %v858_v27 = vld [vmem:[#allocation18 + $0x50] sm:$0xff] }
 0x15e   :  { %802 = vmatpush.msra.mxu1 %v629_v57  ;;  %869 = vmatpush.msra.mxu3 %v858_v27  ;;  %v853_v57 = vld [vmem:[#allocation18 + $0x28] sm:$0xff] }
 0x15f   :  { %v414_v20 = vadd.f32 %v413_v18, %v238_v17 }
 0x160   :  { %803 = vmatpush.msra.mxu1 %v628_v61  ;;  %870 = vmatpush.msra.mxu3 %v857_v53  ;;  %v849_v61 = vld [vmem:[#allocation18 + $0x8] sm:$0xff] }
 0x162   :  { %804 = vmatpush.msra.mxu1 %v627_v63  ;;  %871 = vmatpush.msra.mxu3 %v856_v54 }
 0x164   :  { %805 = vmatpush.msra.mxu1 %v626_v1  ;;  %872 = vmatpush.msra.mxu3 %v855_v55 }
 0x165   :  { %738 = vmatmul.f32.vlgmr.msrb.gmra.mxu1 %v334_v12 }
 0x166   :  { %806 = vmatpush.msra.mxu1 %v625_v3  ;;  %873 = vmatpush.msra.mxu3 %v854_v56 }
 0x168   :  { %807 = vmatpush.msra.mxu1 %v624_v5  ;;  %874 = vmatpush.msra.mxu3 %v853_v57 }
 0x16a   :  { %808 = vmatpush.msra.mxu1 %v623_v6  ;;  %875 = vmatpush.msra.mxu3 %v852_v58 }
 0x16c   :  { %809 = vmatpush.msra.mxu1 %v622_v7  ;;  %876 = vmatpush.msra.mxu3 %v851_v59 }
 0x16e   :  { %810 = vmatpush.msra.mxu1 %v621_v8  ;;  %877 = vmatpush.msra.mxu3 %v850_v60 }
 0x170   :  { %811 = vmatpush.msra.mxu1 %v620_v11  ;;  %878 = vmatpush.msra.mxu3 %v849_v61 }
 0x172   :  { %812 = vmatpush.msra.mxu1 %v619_v13  ;;  %879 = vmatpush.msra.mxu3 %v848_v62 }
 0x174   :  { %813 = vmatpush.msra.mxu1 %v618_v14  ;;  %v939_v14 = vld [vmem:[%s1397_s11] ss:$0 sm:$0xff] }
 0x176   :  { %814 = vmatpush.msra.mxu1 %v617_v15 }
 0x178   :  { %815 = vmatpush.msra.mxu1 %v616_v16 }
 0x17a   :  { %816 = vmatpush.msra.mxu1 %v615_v19 }
 0x17c   :  { %817 = vmatpush.msra.mxu1 %v614_v21 }
 0x17d   :  { %818 = vmatmul.f32.vlgmr.msra.gmra.mxu1 %v414_v20 }
 0x1ba   :  { %v719_v2 = vpop.f32.mrf.mxu0 }
 0x1be   :  { %v699_v0 = vpop.f32.mrf.mxu3 }
 0x1c6   :  { %v779_v8 = vpop.f32.mrf.mxu3 }
 0x1cc   :  { %v799_v10 = vpop.f32.mrf.mxu0 }
 0x1da   :  { %v515_v23 = vpop.f32.mrf.mxu1 }
 0x1db   :  { %v516_v24 = vadd.f32 %v938_v22, %v515_v23 }
 0x1dd   :  { %678 = vmatmul.f32.vlgmr.msra.gmra.mxu2 %v516_v24 }
 0x1de   :  { %822 = vmatpush.msra.mxu2 %v645_v25 }
 0x1e0   :  { %823 = vmatpush.msra.mxu2 %v644_v28 }
 0x1e2   :  { %824 = vmatpush.msra.mxu2 %v643_v29  ;;  %v739_v4 = vpop.f32.mrf.mxu1 }
 0x1e4   :  { %825 = vmatpush.msra.mxu2 %v642_v32 }
 0x1e5   :  { %758 = vmatmul.f32.vlgmr.msrb.gmra.mxu2 %v354_v31 }
 0x1e6   :  { %826 = vmatpush.msra.mxu2 %v641_v33 }
 0x1e8   :  { %827 = vmatpush.msra.mxu2 %v640_v34 }
 0x1ea   :  { %828 = vmatpush.msra.mxu2 %v639_v35 }
 0x1ec   :  { %829 = vmatpush.msra.mxu2 %v638_v36 }
 0x1ee   :  { %830 = vmatpush.msra.mxu2 %v637_v37 }
 0x1f0   :  { %831 = vmatpush.msra.mxu2 %v636_v38 }
 0x1f2   :  { %832 = vmatpush.msra.mxu2 %v635_v39 }
 0x1f4   :  { %833 = vmatpush.msra.mxu2 %v634_v40 }
 0x1f6   :  { %834 = vmatpush.msra.mxu2 %v633_v41 }
 0x1f8   :  { %835 = vmatpush.msra.mxu2 %v632_v43 }
 0x1fa   :  { %836 = vmatpush.msra.mxu2 %v631_v44  ;;  %v819_v12 = vpop.f32.mrf.mxu1 }
 0x1fc   :  { %837 = vmatpush.msra.mxu2 %v630_v47 }
 0x1fd   :  { %838 = vmatmul.f32.vlgmr.msra.gmra.mxu2 %v434_v46 }
 0x260   :  { %v679_v63 = vpop.f32.mrf.mxu2 }
 0x261   :  { %v700_v1 = vadd.f32 %v699_v0, %v679_v63 }
 0x263   :  { %v720_v3 = vadd.f32 %v719_v2, %v700_v1 }
 0x265   :  { %v740_v6 = vadd.f32 %v739_v4, %v720_v3 }
 0x268   :  { %v759_v5 = vpop.f32.mrf.mxu2 }
 0x269   :  { %v760_v7 = vadd.f32 %v759_v5, %v740_v6 }
 0x26b   :  { %v780_v9 = vadd.f32 %v779_v8, %v760_v7 }
 0x26d   :  { %v800_v11 = vadd.f32 %v799_v10, %v780_v9 }
 0x26f   :  { %v820_v13 = vadd.f32 %v819_v12, %v800_v11 }
 0x280   :  { %v839_v15 = vpop.f32.mrf.mxu2 }
 0x281   :  { %v840_v16 = vadd.f32 %v839_v15, %v820_v13 }
 0x283   :  { %v846_v17 = vadd.f32 %v939_v14, %v840_v16 }
 0x285   :  { %v847_v18 = vmax.f32 %v846_v17, 0.0 }
 0x287   :  { %880 = vmatmul.f32.vlgmr.msra.gmra.mxu3 %v847_v18 }
 0x30a   :  { %v881_v19 = vpop.f32.mrf.mxu3 }
 0x30b   :  { %884 = vst [vmem:[#allocation20] sm:$0x3] %v881_v19 }
 0x30c   :  { %895 = dma.vmem_to_hbm [thread:$0]  %s891_s17, 32, %s893_s20, [#allocation5]  }
 0x30d   :  { %1216 = dma.done.wait [#allocation5], 32  }
 0x30e   :  { %1217 = vsyncadd [#allocation5], 4294967264 }
 0x30f   :  { %900 = vsyncpa [#allocation4], 1 }
 0x310   :  { %901 = vsyncpa [#allocation7], 1 }
 0x311   :  { %902 = vsyncpa [#allocation10], 1 }
 0x312   :  { %903 = vsyncpa [#allocation13], 1 }
 0x313   :  { %904 = vsyncpa [#allocation16], 1 }
 0x314   :  { %905 = vsyncpa [#allocation19], 1 }
 0x315   :  { %906 = vsyncpa [#allocation5], 1 }

</bundles_post_ra>
